<compile_context>
chip_gen: v7x
topology: tpu7x:2x2x1
jax: 0.10.0
libtpu: 0.0.40
codegen_flags: <defaults>
</compile_context>

<pallas_src>
import functools
import math

import jax
import jax.numpy as jnp
from jax.experimental import pallas as pl
from jax.experimental.pallas import tpu as pltpu


TS_TARGET = 512                        # target sublane rows per tile (~64K elems)
VMEM_LIMIT_BYTES = 48 * 1024 * 1024    # < v7x 64 MiB physical, > our ~33 MiB use


def _lcm(a, b):
    return a * b // math.gcd(a, b)


def _yolov2_loss_kernel(pred_ref, tgt_ref, out_ref, anc_ref, *,
                        B, M, TS, n_inner, anchors,
                        lambda_coord, lambda_noobj):
    o = pl.program_id(0)      # "parallel" axis: one partial sum per TensorCore
    i = pl.program_id(1)      # "arbitrary" axis: accumulation
    f32 = jnp.float32

    @pl.when(i == 0)
    def _init():
        out_ref[...] = jnp.zeros_like(out_ref)
        # Anchor pattern is tile-invariant: every tile's flat base is a
        # multiple of B (single tile, or TS*128 % B == 0), so the anchor id is
        # (local flat index) mod B.  local < TS*128 <= 2**17, so the float mod
        # is exact.  Built once per core into scratch, reused every step.
        sub = jax.lax.broadcasted_iota(jnp.int32, (TS, 128), 0).astype(f32)
        lane = jax.lax.broadcasted_iota(jnp.int32, (TS, 128), 1).astype(f32)
        local = sub * 128.0 + lane
        b_id = local - jnp.floor((local + 0.5) / f32(B)) * f32(B)
        aw = jnp.zeros((TS, 128), f32)
        ah = jnp.zeros((TS, 128), f32)
        for k in range(B):                      # B is small and static
            sel = b_id == f32(k)
            aw = jnp.where(sel, f32(anchors[k][0]), aw)
            ah = jnp.where(sel, f32(anchors[k][1]), ah)
        anc_ref[0] = aw
        anc_ref[1] = ah

    aw = anc_ref[0]
    ah = anc_ref[1]

    def fld(ref, r):
        return ref[r].astype(f32)               # dense (TS, 128) tile

    tx_p, ty_p, tw_p, th_p, conf_p = (fld(pred_ref, 0), fld(pred_ref, 1),
                                      fld(pred_ref, 2), fld(pred_ref, 3),
                                      fld(pred_ref, 4))
    tx_t, ty_t, tw_t, th_t, conf_t = (fld(tgt_ref, 0), fld(tgt_ref, 1),
                                      fld(tgt_ref, 2), fld(tgt_ref, 3),
                                      fld(tgt_ref, 4))

    # Box corners.  The reference's grid offsets (gx, gy) translate and the
    # 1/S factor scales predicted and target boxes identically; IoU is
    # translation- and scale-invariant, so both are dropped analytically.
    def corners(tx, ty, tw, th):
        bx = jax.nn.sigmoid(tx)
        by = jax.nn.sigmoid(ty)
        hw = 0.5 * aw * jnp.exp(tw)
        hh = 0.5 * ah * jnp.exp(th)
        return bx - hw, by - hh, bx + hw, by + hh

    x1p, y1p, x2p, y2p = corners(tx_p, ty_p, tw_p, th_p)
    x1t, y1t, x2t, y2t = corners(tx_t, ty_t, tw_t, th_t)

    iw = jnp.maximum(jnp.minimum(x2p, x2t) - jnp.maximum(x1p, x1t), 0.0)
    ih = jnp.maximum(jnp.minimum(y2p, y2t) - jnp.maximum(y1p, y1t), 0.0)
    inter = iw * ih
    area_p = (x2p - x1p) * (y2p - y1p)
    area_t = (x2t - x1t) * (y2t - y1t)
    iou = inter / (area_p + area_t - inter + 1e-16)

    obj = jnp.where(conf_t > 0.0, 1.0, 0.0).astype(f32)
    conf_target = iou * obj

    coord_sq = ((tx_p - tx_t) ** 2 + (ty_p - ty_t) ** 2 +
                (tw_p - tw_t) ** 2 + (th_p - th_t) ** 2)

    # Class loss: static unrolled channel loop keeps temporaries at one dense
    # (TS, 128) tile each (no (C, TS, 128) slab materialized in VMEM).
    D = pred_ref.shape[0]
    class_sq = jnp.zeros((TS, 128), f32)
    for c in range(5, D):
        dc = fld(pred_ref, c) - fld(tgt_ref, c)
        class_sq = class_sq + dc * dc

    conf_sq_all = conf_p * conf_p
    conf_sq_obj = (conf_p - conf_target) ** 2

    # Fused per-element loss:
    #   obj*(lc*coord + class + conf_obj) + ln*(1-obj)*conf_p^2
    per_lane = (obj * (lambda_coord * coord_sq + class_sq + conf_sq_obj
                       - lambda_noobj * conf_sq_all)
                + lambda_noobj * conf_sq_all)

    # Mask padding / overrun / clamped-duplicate lanes using the *logical*
    # (unclamped) tile position.  jnp.where is a select applied after all the
    # math and before accumulation, so NaN/Inf in masked lanes is discarded.
    base = (o * n_inner + i) * (TS * 128)
    sub_i = jax.lax.broadcasted_iota(jnp.int32, (TS, 128), 0)
    lane_i = jax.lax.broadcasted_iota(jnp.int32, (TS, 128), 1)
    flat = base + sub_i * 128 + lane_i
    per_lane = jnp.where(flat < M, per_lane, 0.0)

    # Reduce along tile-aligned sublane groups only (pure vreg adds); final
    # (8,128) -> scalar reduce happens once in the wrapper.
    out_ref[...] += jnp.sum(per_lane.reshape(TS // 8, 8, 128), axis=0)


def yolov2_loss(predictions, targets, *, anchors, S, B, num_classes,
                lambda_coord=5.0, lambda_noobj=0.5):
    N = predictions.shape[0]
    D = 5 + num_classes
    assert predictions.shape == (N, S, S, B, D), predictions.shape
    assert targets.shape == predictions.shape
    M = N * S * S * B

    # Layout: channels-first, (sublane, lane)-dense slab (D, MS, 128).  The
    # pad+reshape+transpose is a single XLA copy; allow_input_fusion lets XLA
    # fuse it into the pallas_call input DMAs instead of a separate HBM pass.
    M_pad = ((M + 1023) // 1024) * 1024          # multiple of 8*128
    p2 = predictions.reshape(M, D)
    t2 = targets.reshape(M, D)
    if M_pad != M:
        p2 = jnp.pad(p2, ((0, M_pad - M), (0, 0)))
        t2 = jnp.pad(t2, ((0, M_pad - M), (0, 0)))
    MS = M_pad // 128
    pred_cf = p2.reshape(MS, 128, D).transpose(2, 0, 1)   # (D, MS, 128)
    tgt_cf = t2.reshape(MS, 128, D).transpose(2, 0, 1)

    # Tile selection: TS sublane rows per tile; multiple of 8 (sublane rule)
    # and, for multi-tile grids, of B/gcd(128,B) so every tile's flat base is
    # a multiple of B (keeps the hoisted anchor pattern tile-invariant).
    unit = _lcm(8, B // math.gcd(128, B))
    ts_cap = max((TS_TARGET // unit) * unit, unit)
    TS = MS if MS <= ts_cap else ts_cap
    n_tiles = -(-MS // TS)
    n_outer = 2                                   # v7x: one partial per core
    n_inner = -(-n_tiles // n_outer)

    kernel = functools.partial(
        _yolov2_loss_kernel, B=B, M=M, TS=TS, n_inner=n_inner,
        anchors=tuple((float(w), float(h)) for (w, h) in anchors),
        lambda_coord=float(lambda_coord), lambda_noobj=float(lambda_noobj))

    def in_map(o, i):
        # Clamp: overrun tiles (odd n_tiles on the second core) re-read the
        # last tile; their contribution is fully masked inside the kernel.
        return (0, jnp.minimum(o * n_inner + i, n_tiles - 1), 0)

    partials = pl.pallas_call(
        kernel,
        grid=(n_outer, n_inner),
        in_specs=[pl.BlockSpec((D, TS, 128), in_map),
                  pl.BlockSpec((D, TS, 128), in_map)],
        out_specs=pl.BlockSpec((None, 8, 128), lambda o, i: (o, 0, 0)),
        out_shape=jax.ShapeDtypeStruct((n_outer, 8, 128), jnp.float32),
        scratch_shapes=[pltpu.VMEM((2, TS, 128), jnp.float32)],
        compiler_params=pltpu.CompilerParams(
            dimension_semantics=("parallel", "arbitrary"),
            vmem_limit_bytes=VMEM_LIMIT_BYTES,
            allow_input_fusion=[True, True]),
    )(pred_cf, tgt_cf)
    return jnp.sum(partials)


# ---------------------------------------------------------------------------
# Pure-JAX reference (mirrors the PyTorch forward, original NSSBD layout).
# ---------------------------------------------------------------------------
def yolov2_loss_ref(predictions, targets, *, anchors, S, B, num_classes,
                    lambda_coord=5.0, lambda_noobj=0.5):
    anc = jnp.asarray(anchors, dtype=jnp.float32).reshape(1, 1, 1, B, 2)
    grid_y, grid_x = jnp.meshgrid(jnp.arange(S, dtype=jnp.float32),
                                  jnp.arange(S, dtype=jnp.float32),
                                  indexing="ij")
    grid = jnp.stack([grid_x, grid_y], axis=-1)[None, :, :, None, :]

    def to_box(p):
        tx, ty, tw, th = p[..., 0], p[..., 1], p[..., 2], p[..., 3]
        bx = (jax.nn.sigmoid(tx) + grid[..., 0]) / S
        by = (jax.nn.sigmoid(ty) + grid[..., 1]) / S
        bw = anc[..., 0] * jnp.exp(tw) / S
        bh = anc[..., 1] * jnp.exp(th) / S
        return jnp.stack([bx - bw / 2, by - bh / 2, bx + bw / 2, by + bh / 2],
                         axis=-1)

    tx_p, ty_p, tw_p, th_p, conf_p, class_p = (
        predictions[..., 0], predictions[..., 1], predictions[..., 2],
        predictions[..., 3], predictions[..., 4], predictions[..., 5:])
    tx_t, ty_t, tw_t, th_t, conf_t, class_t = (
        targets[..., 0], targets[..., 1], targets[..., 2],
        targets[..., 3], targets[..., 4], targets[..., 5:])

    pred_boxes = to_box(predictions)
    target_boxes = to_box(targets)

    obj_mask = (conf_t > 0).astype(jnp.float32)
    noobj_mask = 1.0 - obj_mask

    inter_x1 = jnp.maximum(pred_boxes[..., 0], target_boxes[..., 0])
    inter_y1 = jnp.maximum(pred_boxes[..., 1], target_boxes[..., 1])
    inter_x2 = jnp.minimum(pred_boxes[..., 2], target_boxes[..., 2])
    inter_y2 = jnp.minimum(pred_boxes[..., 3], target_boxes[..., 3])
    inter_area = (jnp.clip(inter_x2 - inter_x1, 0) *
                  jnp.clip(inter_y2 - inter_y1, 0))
    pred_area = ((pred_boxes[..., 2] - pred_boxes[..., 0]) *
                 (pred_boxes[..., 3] - pred_boxes[..., 1]))
    tgt_area = ((target_boxes[..., 2] - target_boxes[..., 0]) *
                (target_boxes[..., 3] - target_boxes[..., 1]))
    iou = inter_area / (pred_area + tgt_area - inter_area + 1e-16)
    conf_target = iou * obj_mask

    coord_loss = lambda_coord * jnp.sum(
        obj_mask * ((tx_p - tx_t) ** 2 + (ty_p - ty_t) ** 2))
    coord_loss += lambda_coord * jnp.sum(
        obj_mask * ((tw_p - tw_t) ** 2 + (th_p - th_t) ** 2))
    conf_loss = (jnp.sum(obj_mask * (conf_p - conf_target) ** 2) +
                 lambda_noobj * jnp.sum(noobj_mask * conf_p ** 2))
    class_loss = jnp.sum(obj_mask[..., None] * (class_p - class_t) ** 2)
    return coord_loss + conf_loss + class_loss


if __name__ == "__main__":
    # Small, module-consistent shapes: (N, S, S, B, 5 + num_classes)
    N, S, B, C = 2, 8, 5, 20
    D = 5 + C
    anchors = [(1.3221, 1.73145), (3.19275, 4.00944), (5.05587, 8.09892),
               (9.47112, 4.84053), (11.2364, 10.0071)]

    key = jax.random.PRNGKey(0)
    kp, kt = jax.random.split(key)
    predictions = jax.random.normal(kp, (N, S, S, B, D), dtype=jnp.float32)
    targets = jax.random.normal(kt, (N, S, S, B, D), dtype=jnp.float32)

    loss = yolov2_loss(predictions, targets, anchors=anchors, S=S, B=B,
                       num_classes=C, lambda_coord=5.0, lambda_noobj=0.5)
    loss = jax.block_until_ready(loss)

    ref = yolov2_loss_ref(predictions, targets, anchors=anchors, S=S, B=B,
                          num_classes=C, lambda_coord=5.0, lambda_noobj=0.5)
    ref = jax.block_until_ready(ref)

    assert jnp.allclose(loss, ref, rtol=2e-3, atol=1e-2), (loss, ref)
    print("KERNEL_OK")
</pallas_src>

<mosaic_0001>
module attributes {stable_mosaic.version = 11 : i64} {
  func.func @_yolov2_loss_kernel(%arg0: i32, %arg1: i32, %arg2: memref<25x8x128xf32, #tpu.memory_space<vmem>>, %arg3: memref<25x8x128xf32, #tpu.memory_space<vmem>>, %arg4: memref<1x8x128xf32, #tpu.memory_space<vmem>>, %arg5: memref<2x8x128xf32, #tpu.memory_space<vmem>>) attributes {dimension_semantics = [#tpu.dimension_semantics<parallel>, #tpu.dimension_semantics<arbitrary>], iteration_bounds = array<i64: 2, 1>, scalar_prefetch = 0 : i64, scratch_operands = 1 : i64, tpu.core_type = #tpu.core_type<tc>, window_params = [{transform_indices = @transform_0, window_bounds = array<i64: 25, 8, 128>}, {transform_indices = @transform_1, window_bounds = array<i64: 25, 8, 128>}, {transform_indices = @transform_2, window_bounds = array<i64: 1, 8, 128>}]} {
    %c0_i32 = arith.constant 0 : i32
    %0 = arith.cmpi eq, %arg1, %c0_i32 : i32
    %1 = arith.extui %0 : i1 to i32
    %c0_i32_0 = arith.constant 0 : i32
    %2 = arith.cmpi ne, %1, %c0_i32_0 : i32
    scf.if %2 {
      %cst_157 = arith.constant 0.000000e+00 : f32
      %287 = vector.broadcast %cst_157 : f32 to vector<8x128xf32>
      %c0_158 = arith.constant 0 : index
      %c0_159 = arith.constant 0 : index
      %c0_160 = arith.constant 0 : index
      %288 = vector.load %arg4[%c0_158, %c0_159, %c0_160] : memref<1x8x128xf32, #tpu.memory_space<vmem>>, vector<1x8x128xf32>
      %289 = vector.shape_cast %288 : vector<1x8x128xf32> to vector<8x128xf32>
      %290 = vector.shape_cast %287 : vector<8x128xf32> to vector<1x8x128xf32>
      tpu.vector_store %arg4[%c0_158, %c0_159, %c0_160], %290 {strides = array<i32>} : memref<1x8x128xf32, #tpu.memory_space<vmem>>, vector<1x8x128xf32>,
      %291 = tpu.iota {dimensions = array<i32: 0>} : vector<8x128xi32>
      %292 = arith.sitofp %291 : vector<8x128xi32> to vector<8x128xf32>
      %293 = tpu.iota {dimensions = array<i32: 1>} : vector<8x128xi32>
      %294 = arith.sitofp %293 : vector<8x128xi32> to vector<8x128xf32>
      %cst_161 = arith.constant 1.280000e+02 : f32
      %295 = vector.broadcast %cst_161 : f32 to vector<8x128xf32>
      %296 = arith.mulf %292, %295 : vector<8x128xf32>
      %297 = arith.addf %296, %294 : vector<8x128xf32>
      %cst_162 = arith.constant 5.000000e-01 : f32
      %298 = vector.broadcast %cst_162 : f32 to vector<8x128xf32>
      %299 = arith.addf %297, %298 : vector<8x128xf32>
      %cst_163 = arith.constant 5.000000e+00 : f32
      %300 = vector.broadcast %cst_163 : f32 to vector<8x128xf32>
      %301 = arith.divf %299, %300 : vector<8x128xf32>
      %302 = math.floor %301 : vector<8x128xf32>
      %cst_164 = arith.constant 5.000000e+00 : f32
      %303 = vector.broadcast %cst_164 : f32 to vector<8x128xf32>
      %304 = arith.mulf %302, %303 : vector<8x128xf32>
      %305 = arith.subf %297, %304 : vector<8x128xf32>
      %cst_165 = arith.constant 0.000000e+00 : f32
      %306 = vector.broadcast %cst_165 : f32 to vector<8x128xf32>
      %cst_166 = arith.constant 0.000000e+00 : f32
      %307 = vector.broadcast %cst_166 : f32 to vector<8x128xf32>
      %cst_167 = arith.constant 0.000000e+00 : f32
      %308 = vector.broadcast %cst_167 : f32 to vector<8x128xf32>
      %309 = arith.cmpf oeq, %305, %308 : vector<8x128xf32>
      %cst_168 = arith.constant 1.322100e+00 : f32
      %310 = vector.broadcast %cst_168 : f32 to vector<8x128xf32>
      %311 = arith.select %309, %310, %306 : vector<8x128xi1>, vector<8x128xf32>
      %cst_169 = arith.constant 1.731450e+00 : f32
      %312 = vector.broadcast %cst_169 : f32 to vector<8x128xf32>
      %313 = arith.select %309, %312, %307 : vector<8x128xi1>, vector<8x128xf32>
      %cst_170 = arith.constant 1.000000e+00 : f32
      %314 = vector.broadcast %cst_170 : f32 to vector<8x128xf32>
      %315 = arith.cmpf oeq, %305, %314 : vector<8x128xf32>
      %cst_171 = arith.constant 3.192750e+00 : f32
      %316 = vector.broadcast %cst_171 : f32 to vector<8x128xf32>
      %317 = arith.select %315, %316, %311 : vector<8x128xi1>, vector<8x128xf32>
      %cst_172 = arith.constant 4.009440e+00 : f32
      %318 = vector.broadcast %cst_172 : f32 to vector<8x128xf32>
      %319 = arith.select %315, %318, %313 : vector<8x128xi1>, vector<8x128xf32>
      %cst_173 = arith.constant 2.000000e+00 : f32
      %320 = vector.broadcast %cst_173 : f32 to vector<8x128xf32>
      %321 = arith.cmpf oeq, %305, %320 : vector<8x128xf32>
      %cst_174 = arith.constant 5.055870e+00 : f32
      %322 = vector.broadcast %cst_174 : f32 to vector<8x128xf32>
      %323 = arith.select %321, %322, %317 : vector<8x128xi1>, vector<8x128xf32>
      %cst_175 = arith.constant 8.09891986 : f32
      %324 = vector.broadcast %cst_175 : f32 to vector<8x128xf32>
      %325 = arith.select %321, %324, %319 : vector<8x128xi1>, vector<8x128xf32>
      %cst_176 = arith.constant 3.000000e+00 : f32
      %326 = vector.broadcast %cst_176 : f32 to vector<8x128xf32>
      %327 = arith.cmpf oeq, %305, %326 : vector<8x128xf32>
      %cst_177 = arith.constant 9.47111988 : f32
      %328 = vector.broadcast %cst_177 : f32 to vector<8x128xf32>
      %329 = arith.select %327, %328, %323 : vector<8x128xi1>, vector<8x128xf32>
      %cst_178 = arith.constant 4.840530e+00 : f32
      %330 = vector.broadcast %cst_178 : f32 to vector<8x128xf32>
      %331 = arith.select %327, %330, %325 : vector<8x128xi1>, vector<8x128xf32>
      %cst_179 = arith.constant 4.000000e+00 : f32
      %332 = vector.broadcast %cst_179 : f32 to vector<8x128xf32>
      %333 = arith.cmpf oeq, %305, %332 : vector<8x128xf32>
      %cst_180 = arith.constant 1.123640e+01 : f32
      %334 = vector.broadcast %cst_180 : f32 to vector<8x128xf32>
      %335 = arith.select %333, %334, %329 : vector<8x128xi1>, vector<8x128xf32>
      %cst_181 = arith.constant 1.000710e+01 : f32
      %336 = vector.broadcast %cst_181 : f32 to vector<8x128xf32>
      %337 = arith.select %333, %336, %331 : vector<8x128xi1>, vector<8x128xf32>
      %c0_182 = arith.constant 0 : index
      %c0_183 = arith.constant 0 : index
      %c0_184 = arith.constant 0 : index
      %338 = vector.load %arg5[%c0_182, %c0_183, %c0_184] : memref<2x8x128xf32, #tpu.memory_space<vmem>>, vector<1x8x128xf32>
      %339 = vector.shape_cast %338 : vector<1x8x128xf32> to vector<8x128xf32>
      %340 = vector.shape_cast %335 : vector<8x128xf32> to vector<1x8x128xf32>
      tpu.vector_store %arg5[%c0_182, %c0_183, %c0_184], %340 {strides = array<i32>} : memref<2x8x128xf32, #tpu.memory_space<vmem>>, vector<1x8x128xf32>,
      %c1_185 = arith.constant 1 : index
      %c0_186 = arith.constant 0 : index
      %c0_187 = arith.constant 0 : index
      %341 = vector.load %arg5[%c1_185, %c0_186, %c0_187] : memref<2x8x128xf32, #tpu.memory_space<vmem>>, vector<1x8x128xf32>
      %342 = vector.shape_cast %341 : vector<1x8x128xf32> to vector<8x128xf32>
      %343 = vector.shape_cast %337 : vector<8x128xf32> to vector<1x8x128xf32>
      tpu.vector_store %arg5[%c1_185, %c0_186, %c0_187], %343 {strides = array<i32>} : memref<2x8x128xf32, #tpu.memory_space<vmem>>, vector<1x8x128xf32>,
    } else {
    }
    %c0 = arith.constant 0 : index
    %c0_1 = arith.constant 0 : index
    %c0_2 = arith.constant 0 : index
    %3 = vector.load %arg5[%c0, %c0_1, %c0_2] : memref<2x8x128xf32, #tpu.memory_space<vmem>>, vector<1x8x128xf32>
    %4 = vector.shape_cast %3 : vector<1x8x128xf32> to vector<8x128xf32>
    %c1 = arith.constant 1 : index
    %c0_3 = arith.constant 0 : index
    %c0_4 = arith.constant 0 : index
    %5 = vector.load %arg5[%c1, %c0_3, %c0_4] : memref<2x8x128xf32, #tpu.memory_space<vmem>>, vector<1x8x128xf32>
    %6 = vector.shape_cast %5 : vector<1x8x128xf32> to vector<8x128xf32>
    %c0_5 = arith.constant 0 : index
    %c0_6 = arith.constant 0 : index
    %c0_7 = arith.constant 0 : index
    %7 = vector.load %arg2[%c0_5, %c0_6, %c0_7] : memref<25x8x128xf32, #tpu.memory_space<vmem>>, vector<1x8x128xf32>
    %8 = vector.shape_cast %7 : vector<1x8x128xf32> to vector<8x128xf32>
    %c1_8 = arith.constant 1 : index
    %c0_9 = arith.constant 0 : index
    %c0_10 = arith.constant 0 : index
    %9 = vector.load %arg2[%c1_8, %c0_9, %c0_10] : memref<25x8x128xf32, #tpu.memory_space<vmem>>, vector<1x8x128xf32>
    %10 = vector.shape_cast %9 : vector<1x8x128xf32> to vector<8x128xf32>
    %c2 = arith.constant 2 : index
    %c0_11 = arith.constant 0 : index
    %c0_12 = arith.constant 0 : index
    %11 = vector.load %arg2[%c2, %c0_11, %c0_12] : memref<25x8x128xf32, #tpu.memory_space<vmem>>, vector<1x8x128xf32>
    %12 = vector.shape_cast %11 : vector<1x8x128xf32> to vector<8x128xf32>
    %c3 = arith.constant 3 : index
    %c0_13 = arith.constant 0 : index
    %c0_14 = arith.constant 0 : index
    %13 = vector.load %arg2[%c3, %c0_13, %c0_14] : memref<25x8x128xf32, #tpu.memory_space<vmem>>, vector<1x8x128xf32>
    %14 = vector.shape_cast %13 : vector<1x8x128xf32> to vector<8x128xf32>
    %c4 = arith.constant 4 : index
    %c0_15 = arith.constant 0 : index
    %c0_16 = arith.constant 0 : index
    %15 = vector.load %arg2[%c4, %c0_15, %c0_16] : memref<25x8x128xf32, #tpu.memory_space<vmem>>, vector<1x8x128xf32>
    %16 = vector.shape_cast %15 : vector<1x8x128xf32> to vector<8x128xf32>
    %c0_17 = arith.constant 0 : index
    %c0_18 = arith.constant 0 : index
    %c0_19 = arith.constant 0 : index
    %17 = vector.load %arg3[%c0_17, %c0_18, %c0_19] : memref<25x8x128xf32, #tpu.memory_space<vmem>>, vector<1x8x128xf32>
    %18 = vector.shape_cast %17 : vector<1x8x128xf32> to vector<8x128xf32>
    %c1_20 = arith.constant 1 : index
    %c0_21 = arith.constant 0 : index
    %c0_22 = arith.constant 0 : index
    %19 = vector.load %arg3[%c1_20, %c0_21, %c0_22] : memref<25x8x128xf32, #tpu.memory_space<vmem>>, vector<1x8x128xf32>
    %20 = vector.shape_cast %19 : vector<1x8x128xf32> to vector<8x128xf32>
    %c2_23 = arith.constant 2 : index
    %c0_24 = arith.constant 0 : index
    %c0_25 = arith.constant 0 : index
    %21 = vector.load %arg3[%c2_23, %c0_24, %c0_25] : memref<25x8x128xf32, #tpu.memory_space<vmem>>, vector<1x8x128xf32>
    %22 = vector.shape_cast %21 : vector<1x8x128xf32> to vector<8x128xf32>
    %c3_26 = arith.constant 3 : index
    %c0_27 = arith.constant 0 : index
    %c0_28 = arith.constant 0 : index
    %23 = vector.load %arg3[%c3_26, %c0_27, %c0_28] : memref<25x8x128xf32, #tpu.memory_space<vmem>>, vector<1x8x128xf32>
    %24 = vector.shape_cast %23 : vector<1x8x128xf32> to vector<8x128xf32>
    %c4_29 = arith.constant 4 : index
    %c0_30 = arith.constant 0 : index
    %c0_31 = arith.constant 0 : index
    %25 = vector.load %arg3[%c4_29, %c0_30, %c0_31] : memref<25x8x128xf32, #tpu.memory_space<vmem>>, vector<1x8x128xf32>
    %26 = vector.shape_cast %25 : vector<1x8x128xf32> to vector<8x128xf32>
    %27 = arith.negf %8 : vector<8x128xf32>
    %28 = math.exp %27 : vector<8x128xf32>
    %cst = arith.constant 1.000000e+00 : f32
    %29 = vector.broadcast %cst : f32 to vector<8x128xf32>
    %30 = arith.addf %29, %28 : vector<8x128xf32>
    %31 = arith.divf %29, %30 : vector<8x128xf32>
    %32 = arith.negf %10 : vector<8x128xf32>
    %33 = math.exp %32 : vector<8x128xf32>
    %cst_32 = arith.constant 1.000000e+00 : f32
    %34 = vector.broadcast %cst_32 : f32 to vector<8x128xf32>
    %35 = arith.addf %34, %33 : vector<8x128xf32>
    %36 = arith.divf %34, %35 : vector<8x128xf32>
    %cst_33 = arith.constant 5.000000e-01 : f32
    %37 = vector.broadcast %cst_33 : f32 to vector<8x128xf32>
    %38 = arith.mulf %37, %4 : vector<8x128xf32>
    %39 = math.exp %12 : vector<8x128xf32>
    %40 = arith.mulf %38, %39 : vector<8x128xf32>
    %cst_34 = arith.constant 5.000000e-01 : f32
    %41 = vector.broadcast %cst_34 : f32 to vector<8x128xf32>
    %42 = arith.mulf %41, %6 : vector<8x128xf32>
    %43 = math.exp %14 : vector<8x128xf32>
    %44 = arith.mulf %42, %43 : vector<8x128xf32>
    %45 = arith.subf %31, %40 : vector<8x128xf32>
    %46 = arith.subf %36, %44 : vector<8x128xf32>
    %47 = arith.addf %31, %40 : vector<8x128xf32>
    %48 = arith.addf %36, %44 : vector<8x128xf32>
    %49 = arith.negf %18 : vector<8x128xf32>
    %50 = math.exp %49 : vector<8x128xf32>
    %cst_35 = arith.constant 1.000000e+00 : f32
    %51 = vector.broadcast %cst_35 : f32 to vector<8x128xf32>
    %52 = arith.addf %51, %50 : vector<8x128xf32>
    %53 = arith.divf %51, %52 : vector<8x128xf32>
    %54 = arith.negf %20 : vector<8x128xf32>
    %55 = math.exp %54 : vector<8x128xf32>
    %cst_36 = arith.constant 1.000000e+00 : f32
    %56 = vector.broadcast %cst_36 : f32 to vector<8x128xf32>
    %57 = arith.addf %56, %55 : vector<8x128xf32>
    %58 = arith.divf %56, %57 : vector<8x128xf32>
    %cst_37 = arith.constant 5.000000e-01 : f32
    %59 = vector.broadcast %cst_37 : f32 to vector<8x128xf32>
    %60 = arith.mulf %59, %4 : vector<8x128xf32>
    %61 = math.exp %22 : vector<8x128xf32>
    %62 = arith.mulf %60, %61 : vector<8x128xf32>
    %cst_38 = arith.constant 5.000000e-01 : f32
    %63 = vector.broadcast %cst_38 : f32 to vector<8x128xf32>
    %64 = arith.mulf %63, %6 : vector<8x128xf32>
    %65 = math.exp %24 : vector<8x128xf32>
    %66 = arith.mulf %64, %65 : vector<8x128xf32>
    %67 = arith.subf %53, %62 : vector<8x128xf32>
    %68 = arith.subf %58, %66 : vector<8x128xf32>
    %69 = arith.addf %53, %62 : vector<8x128xf32>
    %70 = arith.addf %58, %66 : vector<8x128xf32>
    %71 = arith.minimumf %47, %69 : vector<8x128xf32>
    %72 = arith.maximumf %45, %67 : vector<8x128xf32>
    %73 = arith.subf %71, %72 : vector<8x128xf32>
    %cst_39 = arith.constant 0.000000e+00 : f32
    %74 = vector.broadcast %cst_39 : f32 to vector<8x128xf32>
    %75 = arith.maximumf %73, %74 : vector<8x128xf32>
    %76 = arith.minimumf %48, %70 : vector<8x128xf32>
    %77 = arith.maximumf %46, %68 : vector<8x128xf32>
    %78 = arith.subf %76, %77 : vector<8x128xf32>
    %cst_40 = arith.constant 0.000000e+00 : f32
    %79 = vector.broadcast %cst_40 : f32 to vector<8x128xf32>
    %80 = arith.maximumf %78, %79 : vector<8x128xf32>
    %81 = arith.mulf %75, %80 : vector<8x128xf32>
    %82 = arith.subf %47, %45 : vector<8x128xf32>
    %83 = arith.subf %48, %46 : vector<8x128xf32>
    %84 = arith.mulf %82, %83 : vector<8x128xf32>
    %85 = arith.subf %69, %67 : vector<8x128xf32>
    %86 = arith.subf %70, %68 : vector<8x128xf32>
    %87 = arith.mulf %85, %86 : vector<8x128xf32>
    %88 = arith.addf %84, %87 : vector<8x128xf32>
    %89 = arith.subf %88, %81 : vector<8x128xf32>
    %cst_41 = arith.constant 1.000000e-16 : f32
    %90 = vector.broadcast %cst_41 : f32 to vector<8x128xf32>
    %91 = arith.addf %89, %90 : vector<8x128xf32>
    %92 = arith.divf %81, %91 : vector<8x128xf32>
    %cst_42 = arith.constant 0.000000e+00 : f32
    %93 = vector.broadcast %cst_42 : f32 to vector<8x128xf32>
    %94 = arith.cmpf ogt, %26, %93 : vector<8x128xf32>
    %cst_43 = arith.constant 1.000000e+00 : f32
    %cst_44 = arith.constant 0.000000e+00 : f32
    %95 = vector.broadcast %cst_43 : f32 to vector<8x128xf32>
    %96 = vector.broadcast %cst_44 : f32 to vector<8x128xf32>
    %97 = arith.select %94, %95, %96 : vector<8x128xi1>, vector<8x128xf32>
    %98 = arith.mulf %92, %97 : vector<8x128xf32>
    %99 = arith.subf %8, %18 : vector<8x128xf32>
    %100 = arith.mulf %99, %99 : vector<8x128xf32>
    %101 = arith.subf %10, %20 : vector<8x128xf32>
    %102 = arith.mulf %101, %101 : vector<8x128xf32>
    %103 = arith.addf %100, %102 : vector<8x128xf32>
    %104 = arith.subf %12, %22 : vector<8x128xf32>
    %105 = arith.mulf %104, %104 : vector<8x128xf32>
    %106 = arith.addf %103, %105 : vector<8x128xf32>
    %107 = arith.subf %14, %24 : vector<8x128xf32>
    %108 = arith.mulf %107, %107 : vector<8x128xf32>
    %109 = arith.addf %106, %108 : vector<8x128xf32>
    %cst_45 = arith.constant 0.000000e+00 : f32
    %110 = vector.broadcast %cst_45 : f32 to vector<8x128xf32>
    %c5 = arith.constant 5 : index
    %c0_46 = arith.constant 0 : index
    %c0_47 = arith.constant 0 : index
    %111 = vector.load %arg2[%c5, %c0_46, %c0_47] : memref<25x8x128xf32, #tpu.memory_space<vmem>>, vector<1x8x128xf32>
    %112 = vector.shape_cast %111 : vector<1x8x128xf32> to vector<8x128xf32>
    %c5_48 = arith.constant 5 : index
    %c0_49 = arith.constant 0 : index
    %c0_50 = arith.constant 0 : index
    %113 = vector.load %arg3[%c5_48, %c0_49, %c0_50] : memref<25x8x128xf32, #tpu.memory_space<vmem>>, vector<1x8x128xf32>
    %114 = vector.shape_cast %113 : vector<1x8x128xf32> to vector<8x128xf32>
    %115 = arith.subf %112, %114 : vector<8x128xf32>
    %116 = arith.mulf %115, %115 : vector<8x128xf32>
    %117 = arith.addf %110, %116 : vector<8x128xf32>
    %c6 = arith.constant 6 : index
    %c0_51 = arith.constant 0 : index
    %c0_52 = arith.constant 0 : index
    %118 = vector.load %arg2[%c6, %c0_51, %c0_52] : memref<25x8x128xf32, #tpu.memory_space<vmem>>, vector<1x8x128xf32>
    %119 = vector.shape_cast %118 : vector<1x8x128xf32> to vector<8x128xf32>
    %c6_53 = arith.constant 6 : index
    %c0_54 = arith.constant 0 : index
    %c0_55 = arith.constant 0 : index
    %120 = vector.load %arg3[%c6_53, %c0_54, %c0_55] : memref<25x8x128xf32, #tpu.memory_space<vmem>>, vector<1x8x128xf32>
    %121 = vector.shape_cast %120 : vector<1x8x128xf32> to vector<8x128xf32>
    %122 = arith.subf %119, %121 : vector<8x128xf32>
    %123 = arith.mulf %122, %122 : vector<8x128xf32>
    %124 = arith.addf %117, %123 : vector<8x128xf32>
    %c7 = arith.constant 7 : index
    %c0_56 = arith.constant 0 : index
    %c0_57 = arith.constant 0 : index
    %125 = vector.load %arg2[%c7, %c0_56, %c0_57] : memref<25x8x128xf32, #tpu.memory_space<vmem>>, vector<1x8x128xf32>
    %126 = vector.shape_cast %125 : vector<1x8x128xf32> to vector<8x128xf32>
    %c7_58 = arith.constant 7 : index
    %c0_59 = arith.constant 0 : index
    %c0_60 = arith.constant 0 : index
    %127 = vector.load %arg3[%c7_58, %c0_59, %c0_60] : memref<25x8x128xf32, #tpu.memory_space<vmem>>, vector<1x8x128xf32>
    %128 = vector.shape_cast %127 : vector<1x8x128xf32> to vector<8x128xf32>
    %129 = arith.subf %126, %128 : vector<8x128xf32>
    %130 = arith.mulf %129, %129 : vector<8x128xf32>
    %131 = arith.addf %124, %130 : vector<8x128xf32>
    %c8 = arith.constant 8 : index
    %c0_61 = arith.constant 0 : index
    %c0_62 = arith.constant 0 : index
    %132 = vector.load %arg2[%c8, %c0_61, %c0_62] : memref<25x8x128xf32, #tpu.memory_space<vmem>>, vector<1x8x128xf32>
    %133 = vector.shape_cast %132 : vector<1x8x128xf32> to vector<8x128xf32>
    %c8_63 = arith.constant 8 : index
    %c0_64 = arith.constant 0 : index
    %c0_65 = arith.constant 0 : index
    %134 = vector.load %arg3[%c8_63, %c0_64, %c0_65] : memref<25x8x128xf32, #tpu.memory_space<vmem>>, vector<1x8x128xf32>
    %135 = vector.shape_cast %134 : vector<1x8x128xf32> to vector<8x128xf32>
    %136 = arith.subf %133, %135 : vector<8x128xf32>
    %137 = arith.mulf %136, %136 : vector<8x128xf32>
    %138 = arith.addf %131, %137 : vector<8x128xf32>
    %c9 = arith.constant 9 : index
    %c0_66 = arith.constant 0 : index
    %c0_67 = arith.constant 0 : index
    %139 = vector.load %arg2[%c9, %c0_66, %c0_67] : memref<25x8x128xf32, #tpu.memory_space<vmem>>, vector<1x8x128xf32>
    %140 = vector.shape_cast %139 : vector<1x8x128xf32> to vector<8x128xf32>
    %c9_68 = arith.constant 9 : index
    %c0_69 = arith.constant 0 : index
    %c0_70 = arith.constant 0 : index
    %141 = vector.load %arg3[%c9_68, %c0_69, %c0_70] : memref<25x8x128xf32, #tpu.memory_space<vmem>>, vector<1x8x128xf32>
    %142 = vector.shape_cast %141 : vector<1x8x128xf32> to vector<8x128xf32>
    %143 = arith.subf %140, %142 : vector<8x128xf32>
    %144 = arith.mulf %143, %143 : vector<8x128xf32>
    %145 = arith.addf %138, %144 : vector<8x128xf32>
    %c10 = arith.constant 10 : index
    %c0_71 = arith.constant 0 : index
    %c0_72 = arith.constant 0 : index
    %146 = vector.load %arg2[%c10, %c0_71, %c0_72] : memref<25x8x128xf32, #tpu.memory_space<vmem>>, vector<1x8x128xf32>
    %147 = vector.shape_cast %146 : vector<1x8x128xf32> to vector<8x128xf32>
    %c10_73 = arith.constant 10 : index
    %c0_74 = arith.constant 0 : index
    %c0_75 = arith.constant 0 : index
    %148 = vector.load %arg3[%c10_73, %c0_74, %c0_75] : memref<25x8x128xf32, #tpu.memory_space<vmem>>, vector<1x8x128xf32>
    %149 = vector.shape_cast %148 : vector<1x8x128xf32> to vector<8x128xf32>
    %150 = arith.subf %147, %149 : vector<8x128xf32>
    %151 = arith.mulf %150, %150 : vector<8x128xf32>
    %152 = arith.addf %145, %151 : vector<8x128xf32>
    %c11 = arith.constant 11 : index
    %c0_76 = arith.constant 0 : index
    %c0_77 = arith.constant 0 : index
    %153 = vector.load %arg2[%c11, %c0_76, %c0_77] : memref<25x8x128xf32, #tpu.memory_space<vmem>>, vector<1x8x128xf32>
    %154 = vector.shape_cast %153 : vector<1x8x128xf32> to vector<8x128xf32>
    %c11_78 = arith.constant 11 : index
    %c0_79 = arith.constant 0 : index
    %c0_80 = arith.constant 0 : index
    %155 = vector.load %arg3[%c11_78, %c0_79, %c0_80] : memref<25x8x128xf32, #tpu.memory_space<vmem>>, vector<1x8x128xf32>
    %156 = vector.shape_cast %155 : vector<1x8x128xf32> to vector<8x128xf32>
    %157 = arith.subf %154, %156 : vector<8x128xf32>
    %158 = arith.mulf %157, %157 : vector<8x128xf32>
    %159 = arith.addf %152, %158 : vector<8x128xf32>
    %c12 = arith.constant 12 : index
    %c0_81 = arith.constant 0 : index
    %c0_82 = arith.constant 0 : index
    %160 = vector.load %arg2[%c12, %c0_81, %c0_82] : memref<25x8x128xf32, #tpu.memory_space<vmem>>, vector<1x8x128xf32>
    %161 = vector.shape_cast %160 : vector<1x8x128xf32> to vector<8x128xf32>
    %c12_83 = arith.constant 12 : index
    %c0_84 = arith.constant 0 : index
    %c0_85 = arith.constant 0 : index
    %162 = vector.load %arg3[%c12_83, %c0_84, %c0_85] : memref<25x8x128xf32, #tpu.memory_space<vmem>>, vector<1x8x128xf32>
    %163 = vector.shape_cast %162 : vector<1x8x128xf32> to vector<8x128xf32>
    %164 = arith.subf %161, %163 : vector<8x128xf32>
    %165 = arith.mulf %164, %164 : vector<8x128xf32>
    %166 = arith.addf %159, %165 : vector<8x128xf32>
    %c13 = arith.constant 13 : index
    %c0_86 = arith.constant 0 : index
    %c0_87 = arith.constant 0 : index
    %167 = vector.load %arg2[%c13, %c0_86, %c0_87] : memref<25x8x128xf32, #tpu.memory_space<vmem>>, vector<1x8x128xf32>
    %168 = vector.shape_cast %167 : vector<1x8x128xf32> to vector<8x128xf32>
    %c13_88 = arith.constant 13 : index
    %c0_89 = arith.constant 0 : index
    %c0_90 = arith.constant 0 : index
    %169 = vector.load %arg3[%c13_88, %c0_89, %c0_90] : memref<25x8x128xf32, #tpu.memory_space<vmem>>, vector<1x8x128xf32>
    %170 = vector.shape_cast %169 : vector<1x8x128xf32> to vector<8x128xf32>
    %171 = arith.subf %168, %170 : vector<8x128xf32>
    %172 = arith.mulf %171, %171 : vector<8x128xf32>
    %173 = arith.addf %166, %172 : vector<8x128xf32>
    %c14 = arith.constant 14 : index
    %c0_91 = arith.constant 0 : index
    %c0_92 = arith.constant 0 : index
    %174 = vector.load %arg2[%c14, %c0_91, %c0_92] : memref<25x8x128xf32, #tpu.memory_space<vmem>>, vector<1x8x128xf32>
    %175 = vector.shape_cast %174 : vector<1x8x128xf32> to vector<8x128xf32>
    %c14_93 = arith.constant 14 : index
    %c0_94 = arith.constant 0 : index
    %c0_95 = arith.constant 0 : index
    %176 = vector.load %arg3[%c14_93, %c0_94, %c0_95] : memref<25x8x128xf32, #tpu.memory_space<vmem>>, vector<1x8x128xf32>
    %177 = vector.shape_cast %176 : vector<1x8x128xf32> to vector<8x128xf32>
    %178 = arith.subf %175, %177 : vector<8x128xf32>
    %179 = arith.mulf %178, %178 : vector<8x128xf32>
    %180 = arith.addf %173, %179 : vector<8x128xf32>
    %c15 = arith.constant 15 : index
    %c0_96 = arith.constant 0 : index
    %c0_97 = arith.constant 0 : index
    %181 = vector.load %arg2[%c15, %c0_96, %c0_97] : memref<25x8x128xf32, #tpu.memory_space<vmem>>, vector<1x8x128xf32>
    %182 = vector.shape_cast %181 : vector<1x8x128xf32> to vector<8x128xf32>
    %c15_98 = arith.constant 15 : index
    %c0_99 = arith.constant 0 : index
    %c0_100 = arith.constant 0 : index
    %183 = vector.load %arg3[%c15_98, %c0_99, %c0_100] : memref<25x8x128xf32, #tpu.memory_space<vmem>>, vector<1x8x128xf32>
    %184 = vector.shape_cast %183 : vector<1x8x128xf32> to vector<8x128xf32>
    %185 = arith.subf %182, %184 : vector<8x128xf32>
    %186 = arith.mulf %185, %185 : vector<8x128xf32>
    %187 = arith.addf %180, %186 : vector<8x128xf32>
    %c16 = arith.constant 16 : index
    %c0_101 = arith.constant 0 : index
    %c0_102 = arith.constant 0 : index
    %188 = vector.load %arg2[%c16, %c0_101, %c0_102] : memref<25x8x128xf32, #tpu.memory_space<vmem>>, vector<1x8x128xf32>
    %189 = vector.shape_cast %188 : vector<1x8x128xf32> to vector<8x128xf32>
    %c16_103 = arith.constant 16 : index
    %c0_104 = arith.constant 0 : index
    %c0_105 = arith.constant 0 : index
    %190 = vector.load %arg3[%c16_103, %c0_104, %c0_105] : memref<25x8x128xf32, #tpu.memory_space<vmem>>, vector<1x8x128xf32>
    %191 = vector.shape_cast %190 : vector<1x8x128xf32> to vector<8x128xf32>
    %192 = arith.subf %189, %191 : vector<8x128xf32>
    %193 = arith.mulf %192, %192 : vector<8x128xf32>
    %194 = arith.addf %187, %193 : vector<8x128xf32>
    %c17 = arith.constant 17 : index
    %c0_106 = arith.constant 0 : index
    %c0_107 = arith.constant 0 : index
    %195 = vector.load %arg2[%c17, %c0_106, %c0_107] : memref<25x8x128xf32, #tpu.memory_space<vmem>>, vector<1x8x128xf32>
    %196 = vector.shape_cast %195 : vector<1x8x128xf32> to vector<8x128xf32>
    %c17_108 = arith.constant 17 : index
    %c0_109 = arith.constant 0 : index
    %c0_110 = arith.constant 0 : index
    %197 = vector.load %arg3[%c17_108, %c0_109, %c0_110] : memref<25x8x128xf32, #tpu.memory_space<vmem>>, vector<1x8x128xf32>
    %198 = vector.shape_cast %197 : vector<1x8x128xf32> to vector<8x128xf32>
    %199 = arith.subf %196, %198 : vector<8x128xf32>
    %200 = arith.mulf %199, %199 : vector<8x128xf32>
    %201 = arith.addf %194, %200 : vector<8x128xf32>
    %c18 = arith.constant 18 : index
    %c0_111 = arith.constant 0 : index
    %c0_112 = arith.constant 0 : index
    %202 = vector.load %arg2[%c18, %c0_111, %c0_112] : memref<25x8x128xf32, #tpu.memory_space<vmem>>, vector<1x8x128xf32>
    %203 = vector.shape_cast %202 : vector<1x8x128xf32> to vector<8x128xf32>
    %c18_113 = arith.constant 18 : index
    %c0_114 = arith.constant 0 : index
    %c0_115 = arith.constant 0 : index
    %204 = vector.load %arg3[%c18_113, %c0_114, %c0_115] : memref<25x8x128xf32, #tpu.memory_space<vmem>>, vector<1x8x128xf32>
    %205 = vector.shape_cast %204 : vector<1x8x128xf32> to vector<8x128xf32>
    %206 = arith.subf %203, %205 : vector<8x128xf32>
    %207 = arith.mulf %206, %206 : vector<8x128xf32>
    %208 = arith.addf %201, %207 : vector<8x128xf32>
    %c19 = arith.constant 19 : index
    %c0_116 = arith.constant 0 : index
    %c0_117 = arith.constant 0 : index
    %209 = vector.load %arg2[%c19, %c0_116, %c0_117] : memref<25x8x128xf32, #tpu.memory_space<vmem>>, vector<1x8x128xf32>
    %210 = vector.shape_cast %209 : vector<1x8x128xf32> to vector<8x128xf32>
    %c19_118 = arith.constant 19 : index
    %c0_119 = arith.constant 0 : index
    %c0_120 = arith.constant 0 : index
    %211 = vector.load %arg3[%c19_118, %c0_119, %c0_120] : memref<25x8x128xf32, #tpu.memory_space<vmem>>, vector<1x8x128xf32>
    %212 = vector.shape_cast %211 : vector<1x8x128xf32> to vector<8x128xf32>
    %213 = arith.subf %210, %212 : vector<8x128xf32>
    %214 = arith.mulf %213, %213 : vector<8x128xf32>
    %215 = arith.addf %208, %214 : vector<8x128xf32>
    %c20 = arith.constant 20 : index
    %c0_121 = arith.constant 0 : index
    %c0_122 = arith.constant 0 : index
    %216 = vector.load %arg2[%c20, %c0_121, %c0_122] : memref<25x8x128xf32, #tpu.memory_space<vmem>>, vector<1x8x128xf32>
    %217 = vector.shape_cast %216 : vector<1x8x128xf32> to vector<8x128xf32>
    %c20_123 = arith.constant 20 : index
    %c0_124 = arith.constant 0 : index
    %c0_125 = arith.constant 0 : index
    %218 = vector.load %arg3[%c20_123, %c0_124, %c0_125] : memref<25x8x128xf32, #tpu.memory_space<vmem>>, vector<1x8x128xf32>
    %219 = vector.shape_cast %218 : vector<1x8x128xf32> to vector<8x128xf32>
    %220 = arith.subf %217, %219 : vector<8x128xf32>
    %221 = arith.mulf %220, %220 : vector<8x128xf32>
    %222 = arith.addf %215, %221 : vector<8x128xf32>
    %c21 = arith.constant 21 : index
    %c0_126 = arith.constant 0 : index
    %c0_127 = arith.constant 0 : index
    %223 = vector.load %arg2[%c21, %c0_126, %c0_127] : memref<25x8x128xf32, #tpu.memory_space<vmem>>, vector<1x8x128xf32>
    %224 = vector.shape_cast %223 : vector<1x8x128xf32> to vector<8x128xf32>
    %c21_128 = arith.constant 21 : index
    %c0_129 = arith.constant 0 : index
    %c0_130 = arith.constant 0 : index
    %225 = vector.load %arg3[%c21_128, %c0_129, %c0_130] : memref<25x8x128xf32, #tpu.memory_space<vmem>>, vector<1x8x128xf32>
    %226 = vector.shape_cast %225 : vector<1x8x128xf32> to vector<8x128xf32>
    %227 = arith.subf %224, %226 : vector<8x128xf32>
    %228 = arith.mulf %227, %227 : vector<8x128xf32>
    %229 = arith.addf %222, %228 : vector<8x128xf32>
    %c22 = arith.constant 22 : index
    %c0_131 = arith.constant 0 : index
    %c0_132 = arith.constant 0 : index
    %230 = vector.load %arg2[%c22, %c0_131, %c0_132] : memref<25x8x128xf32, #tpu.memory_space<vmem>>, vector<1x8x128xf32>
    %231 = vector.shape_cast %230 : vector<1x8x128xf32> to vector<8x128xf32>
    %c22_133 = arith.constant 22 : index
    %c0_134 = arith.constant 0 : index
    %c0_135 = arith.constant 0 : index
    %232 = vector.load %arg3[%c22_133, %c0_134, %c0_135] : memref<25x8x128xf32, #tpu.memory_space<vmem>>, vector<1x8x128xf32>
    %233 = vector.shape_cast %232 : vector<1x8x128xf32> to vector<8x128xf32>
    %234 = arith.subf %231, %233 : vector<8x128xf32>
    %235 = arith.mulf %234, %234 : vector<8x128xf32>
    %236 = arith.addf %229, %235 : vector<8x128xf32>
    %c23 = arith.constant 23 : index
    %c0_136 = arith.constant 0 : index
    %c0_137 = arith.constant 0 : index
    %237 = vector.load %arg2[%c23, %c0_136, %c0_137] : memref<25x8x128xf32, #tpu.memory_space<vmem>>, vector<1x8x128xf32>
    %238 = vector.shape_cast %237 : vector<1x8x128xf32> to vector<8x128xf32>
    %c23_138 = arith.constant 23 : index
    %c0_139 = arith.constant 0 : index
    %c0_140 = arith.constant 0 : index
    %239 = vector.load %arg3[%c23_138, %c0_139, %c0_140] : memref<25x8x128xf32, #tpu.memory_space<vmem>>, vector<1x8x128xf32>
    %240 = vector.shape_cast %239 : vector<1x8x128xf32> to vector<8x128xf32>
    %241 = arith.subf %238, %240 : vector<8x128xf32>
    %242 = arith.mulf %241, %241 : vector<8x128xf32>
    %243 = arith.addf %236, %242 : vector<8x128xf32>
    %c24 = arith.constant 24 : index
    %c0_141 = arith.constant 0 : index
    %c0_142 = arith.constant 0 : index
    %244 = vector.load %arg2[%c24, %c0_141, %c0_142] : memref<25x8x128xf32, #tpu.memory_space<vmem>>, vector<1x8x128xf32>
    %245 = vector.shape_cast %244 : vector<1x8x128xf32> to vector<8x128xf32>
    %c24_143 = arith.constant 24 : index
    %c0_144 = arith.constant 0 : index
    %c0_145 = arith.constant 0 : index
    %246 = vector.load %arg3[%c24_143, %c0_144, %c0_145] : memref<25x8x128xf32, #tpu.memory_space<vmem>>, vector<1x8x128xf32>
    %247 = vector.shape_cast %246 : vector<1x8x128xf32> to vector<8x128xf32>
    %248 = arith.subf %245, %247 : vector<8x128xf32>
    %249 = arith.mulf %248, %248 : vector<8x128xf32>
    %250 = arith.addf %243, %249 : vector<8x128xf32>
    %251 = arith.mulf %16, %16 : vector<8x128xf32>
    %252 = arith.subf %16, %98 : vector<8x128xf32>
    %253 = arith.mulf %252, %252 : vector<8x128xf32>
    %cst_146 = arith.constant 5.000000e+00 : f32
    %254 = vector.broadcast %cst_146 : f32 to vector<8x128xf32>
    %255 = arith.mulf %254, %109 : vector<8x128xf32>
    %256 = arith.addf %255, %250 : vector<8x128xf32>
    %257 = arith.addf %256, %253 : vector<8x128xf32>
    %cst_147 = arith.constant 5.000000e-01 : f32
    %258 = vector.broadcast %cst_147 : f32 to vector<8x128xf32>
    %259 = arith.mulf %258, %251 : vector<8x128xf32>
    %260 = arith.subf %257, %259 : vector<8x128xf32>
    %261 = arith.mulf %97, %260 : vector<8x128xf32>
    %cst_148 = arith.constant 5.000000e-01 : f32
    %262 = vector.broadcast %cst_148 : f32 to vector<8x128xf32>
    %263 = arith.mulf %262, %251 : vector<8x128xf32>
    %264 = arith.addf %261, %263 : vector<8x128xf32>
    %c1_i32 = arith.constant 1 : i32
    %265 = arith.muli %arg0, %c1_i32 : i32
    %266 = arith.addi %265, %arg1 : i32
    %c1024_i32 = arith.constant 1024 : i32
    %267 = arith.muli %266, %c1024_i32 : i32
    %268 = tpu.iota {dimensions = array<i32: 0>} : vector<8x128xi32>
    %269 = tpu.iota {dimensions = array<i32: 1>} : vector<8x128xi32>
    %c128_i32 = arith.constant 128 : i32
    %270 = vector.broadcast %c128_i32 : i32 to vector<8x128xi32>
    %271 = arith.muli %268, %270 : vector<8x128xi32>
    %272 = vector.broadcast %267 : i32 to vector<8x128xi32>
    %273 = arith.addi %272, %271 : vector<8x128xi32>
    %274 = arith.addi %273, %269 : vector<8x128xi32>
    %c640_i32 = arith.constant 640 : i32
    %275 = vector.broadcast %c640_i32 : i32 to vector<8x128xi32>
    %276 = arith.cmpi slt, %274, %275 : vector<8x128xi32>
    %cst_149 = arith.constant 0.000000e+00 : f32
    %277 = vector.broadcast %cst_149 : f32 to vector<8x128xf32>
    %278 = arith.select %276, %264, %277 : vector<8x128xi1>, vector<8x128xf32>
    %c0_150 = arith.constant 0 : index
    %c0_151 = arith.constant 0 : index
    %c0_152 = arith.constant 0 : index
    %279 = vector.load %arg4[%c0_150, %c0_151, %c0_152] : memref<1x8x128xf32, #tpu.memory_space<vmem>>, vector<1x8x128xf32>
    %280 = vector.shape_cast %279 : vector<1x8x128xf32> to vector<8x128xf32>
    %281 = vector.shape_cast %278 : vector<8x128xf32> to vector<1x8x128xf32>
    %cst_153 = arith.constant dense<0.000000e+00> : vector<8x128xf32>
    %282 = vector.multi_reduction <add>, %281, %cst_153 [0] : vector<1x8x128xf32> to vector<8x128xf32>
    %283 = arith.addf %280, %282 : vector<8x128xf32>
    %c0_154 = arith.constant 0 : index
    %c0_155 = arith.constant 0 : index
    %c0_156 = arith.constant 0 : index
    %284 = vector.load %arg4[%c0_154, %c0_155, %c0_156] : memref<1x8x128xf32, #tpu.memory_space<vmem>>, vector<1x8x128xf32>
    %285 = vector.shape_cast %284 : vector<1x8x128xf32> to vector<8x128xf32>
    %286 = vector.shape_cast %283 : vector<8x128xf32> to vector<1x8x128xf32>
    tpu.vector_store %arg4[%c0_154, %c0_155, %c0_156], %286 {strides = array<i32>} : memref<1x8x128xf32, #tpu.memory_space<vmem>>, vector<1x8x128xf32>,
    return
  }
  func.func @transform_0(%arg0: i32, %arg1: i32) -> (i32, i32, i32) {
    %c1_i32 = arith.constant 1 : i32
    %0 = arith.muli %arg0, %c1_i32 : i32
    %1 = arith.addi %0, %arg1 : i32
    %c0_i32 = arith.constant 0 : i32
    %2 = arith.minsi %1, %c0_i32 : i32
    %c0_i32_0 = arith.constant 0 : i32
    %c0_i32_1 = arith.constant 0 : i32
    %c0_i32_2 = arith.constant 0 : i32
    return %c0_i32_0, %2, %c0_i32_1 : i32, i32, i32
  }
  func.func @transform_1(%arg0: i32, %arg1: i32) -> (i32, i32, i32) {
    %c1_i32 = arith.constant 1 : i32
    %0 = arith.muli %arg0, %c1_i32 : i32
    %1 = arith.addi %0, %arg1 : i32
    %c0_i32 = arith.constant 0 : i32
    %2 = arith.minsi %1, %c0_i32 : i32
    %c0_i32_0 = arith.constant 0 : i32
    %c0_i32_1 = arith.constant 0 : i32
    %c0_i32_2 = arith.constant 0 : i32
    return %c0_i32_0, %2, %c0_i32_1 : i32, i32, i32
  }
  func.func @transform_2(%arg0: i32, %arg1: i32) -> (i32, i32, i32) {
    %c0_i32 = arith.constant 0 : i32
    %c0_i32_0 = arith.constant 0 : i32
    %c0_i32_1 = arith.constant 0 : i32
    return %arg0, %c0_i32, %c0_i32_0 : i32, i32, i32
  }
}

</mosaic_0001>

<bundles_post_ra>
// kernel: tpu_custom_call.1
= control target key start
LH: loop header
LB: loop body
LE: loop exit
PB: predicated region body
PF: predicated region fallthrough
CT: control target
= control target key end

     0   :  { %7 = vsyncpa [#allocation4], 0  ;;  %s1334_s0 = inlined_call_operand.hbm [shape: f32[25,8,128], index: 0, kind: input, shape index: {}]   ;;  %s1335_s1 = inlined_call_operand.hbm [shape: f32[25,8,128], index: 1, kind: input, shape index: {}]   ;;  %s1336_s2 = inlined_call_operand.hbm [shape: f32[2,8,128], index: 2, kind: output, shape index: {}]  }
   0x1   :  { %9 = vsyncpa [#allocation4 + $0x1], 0 }
   0x2   :  { %10 = vsyncpa [#allocation7], 0 }
   0x3   :  { %12 = vsyncpa [#allocation7 + $0x1], 0 }
   0x4   :  { %13 = vsyncpa [#allocation5], 0 }
   0x5   :  { %15 = vsyncpa [#allocation5 + $0x1], 0  ;;  %s1033_s9 = smov 0   ;;  %s1035_s10 = smov 0  }
   0x6   :  { %s1037_s11 = smov 0   ;;  %s1039_s12 = smov 0  }
   0x7   :  { %s1041_s13 = smov 0   ;;  %s1043_s14 = smov 0  }
   0x8   :  { %s1045_s15 = smov 0   ;;  %s1047_s16 = smov 0  }
   0x9 LB: > { %s655_s17 = sadd.s32 4294967295, %s1010_s16   ;;  %s656_s18 = sadd.s32 4294967294, %s1010_s16   ;;  %s1010_s16 = sphi %s1047_s16, %s21_s16   ;;  %s1006_s15 = sphi %s1045_s15, %s1355_s15   ;;  %s1002_s14 = sphi %s1043_s14, %s1354_s14   ;;  %s998_s13 = sphi %s1041_s13, %s1324_s13   ;;  %s994_s12 = sphi %s1039_s12, %s1353_s12   ;;  %s990_s11 = sphi %s1037_s11, %s1352_s11   ;;  %s986_s10 = sphi %s1035_s10, %s1351_s10   ;;  %s982_s9 = sphi %s1033_s9, %s1350_s9  }
   0xa   : > { %s33_s19 = sadd.s32 1, %s1006_s15  ;;  %p979_p1 = scmp.ne.s32.totalorder %s998_s13, 0 }
   0xb   : > { %p35_p0 = scmp.ge.s32.totalorder %s33_s19, 2  ;;  %p54_p2 = scmp.eq.s32.totalorder %s1010_s16, 0 }
   0xc   : > { %p59_p3 = scmp.ne.s32.totalorder %s998_s13, %s994_s12  ;;  %p60_p5 = scmp.eq.s32.totalorder %s655_s17, 0 }
   0xd   : > { %s1357_s19 = smov (%p35_p0, %s33_s19), 0  ;;  %p1079_p4 = por %p979_p1, %p54_p2 }
   0xe   : > { %p1083_p6 = por %p60_p5, %p59_p3  ;;  %s101_s22 = ssub.s32 %s1006_s15, %s1357_s19 }
   0xf   : > { %p102_p7 = scmp.eq.s32.totalorder %s101_s22, 0  ;;  %s104_s23 = sadd.s32 1, %s990_s11 }
  0x10   : > { %s1340_s21 = scalar_select %p1083_p6, 1, 0 }
  0x11   : > { %s1091_s24 = scalar_select %p102_p7, %s990_s11, %s104_s23  }
  0x12   : > { %p114_p8 = scmp.ne.s32.totalorder %s990_s11, %s986_s10  ;;  %p115_p9 = scmp.eq.s32.totalorder %s655_s17, 1 }
  0x13   : > { %p120_p10 = scmp.ne.s32.totalorder %s986_s10, %s982_s9  ;;  %p121_p11 = scmp.eq.s32.totalorder %s656_s18, 1 }
  0x14   : > { %p1097_p12 = por %p115_p9, %p114_p8  ;;  %p740_p1 = scmp.lt.s32.totalorder %s1010_s16, 2 }
  0x15   : > { %p1102_p0 = por %p121_p11, %p120_p10  ;;  %s1012_s28 = smov [#allocation3]  }
  0x16   : > { %s1341_s25 = scalar_select %p1097_p12, 1, 0 }
  0x17   : > { %s1342_s26 = scalar_select %p1102_p0, 1, 0 }
  0x18   : > { %p1109_p2 = pnand %p740_p1, %p1079_p4  ;;  %s154_s29 = sshll.u32 %s1012_s28, 4  ;;  %s155_s29 = int_to_ptr.vmem [resolvable:$true] %s154_s29 }
  0x19   : > { %s843_s4 = scalar_lea.hbm %s1334_s0, 3200 }
  0x1a   : > { %p844_p3 = scmp.ne.s32.totalorder %s1334_s0, %s843_s4  ;;  %p845_p5 = pneg %p1109_p2 }
  0x1b   : > { %p850_p8 = scmp.lt.u32.totalorder %s843_s4, %s843_s4  ;;  %p852_p9 = scmp.lt.u32.totalorder %s843_s4, %s1334_s0 }
  0x1c   : > { %p846_p4 = pnand %p845_p5, %p844_p3 }
  0x1d   : > { %p853_p10 = por %p852_p9, %p850_p8 }
  0x1e   : > { %p847_p7 = pneg %p846_p4 }
  0x20   : > { %p854_p11 = pnand %p853_p10, %p847_p7 }
  0x22   : > { %857 = shalt.err (!%p854_p11)
}
  0x23   : > { %s858_s12 = scalar_lea.vmem %s155_s29, 3200  ;;  %s865_s17 = scalar_lea.vmem %s155_s29, 6400 }
  0x24   : > { %p859_p1 = scmp.ne.s32.totalorder %s155_s29, %s858_s12  ;;  %p866_p12 = scmp.lt.s32.totalorder %s155_s29, %s155_s29 }
  0x25   : > { %p867_p6 = scmp.lt.s32.totalorder %s865_s17, %s858_s12 }
  0x26   : > { %p861_p13 = pnand %p859_p1, %p845_p5 }
  0x27   : > { %p868_p3 = por %p867_p6, %p866_p12 }
  0x28   : > { %p862_p0 = pneg %p861_p13 }
  0x2a   : > { %p869_p4 = pnand %p868_p3, %p862_p0 }
  0x2c   : > { %872 = shalt.err (!%p869_p4)
}
  0x2d   : > { %s1013_s18 = smov 128   ;;  %s1014_s20 = smov 8  }
  0x2e   : > { %732 = dma.hbm_to_vmem [thread:$0]  (!%p1109_p2), %s1334_s0, 3200, %s155_s29, [#allocation4], %s1013_s18, %s1013_s18, %s1014_s20  }
  0x2f   : > { %p661_p13 = scmp.ge.s32.totalorder %s1010_s16, 1  ;;  %p185_p7 = scmp.lt.s32.totalorder %s1010_s16, 3 }
  0x30   : > { %s1015_s30 = smov [#allocation6]   ;;  %s873_s6 = scalar_lea.hbm %s1335_s1, 3200 }
  0x31   : > { %p1140_p8 = pnand %p661_p13, %p185_p7  ;;  %s177_s3 = sshll.u32 %s1015_s30, 4  ;;  %s178_s3 = int_to_ptr.vmem [resolvable:$true] %s177_s3 }
  0x32   : > { %p874_p6 = scmp.ne.s32.totalorder %s1335_s1, %s873_s6  ;;  %p880_p9 = scmp.lt.u32.totalorder %s873_s6, %s873_s6 }
  0x33   : > { %s1344_s28 = scalar_select %p1140_p8, 1, 0 }
  0x34   : > { %p876_p12 = pnand %p874_p6, %p845_p5  ;;  %p882_p10 = scmp.lt.u32.totalorder %s873_s6, %s1335_s1 }
  0x36   : > { %p877_p0 = pneg %p876_p12  ;;  %p883_p11 = por %p882_p10, %p880_p9 }
  0x38   : > { %p884_p1 = pnand %p883_p11, %p877_p0 }
  0x3a   : > { %887 = shalt.err (!%p884_p1)
}
  0x3b   : > { %s888_s17 = scalar_lea.vmem %s178_s3, 3200  ;;  %s895_s22 = scalar_lea.vmem %s178_s3, 6400 }
  0x3c   : > { %p889_p3 = scmp.ne.s32.totalorder %s178_s3, %s888_s17  ;;  %p896_p7 = scmp.lt.s32.totalorder %s178_s3, %s178_s3 }
  0x3d   : > { %p897_p8 = scmp.lt.s32.totalorder %s895_s22, %s888_s17 }
  0x3e   : > { %p891_p4 = pnand %p889_p3, %p845_p5 }
  0x3f   : > { %p898_p6 = por %p897_p8, %p896_p7 }
  0x40   : > { %p892_p13 = pneg %p891_p4 }
  0x42   : > { %p899_p12 = pnand %p898_p6, %p892_p13 }
  0x44   : > { %902 = shalt.err (!%p899_p12)
}
  0x45   : > { %735 = dma.hbm_to_vmem [thread:$0]  (!%p1109_p2), %s1335_s1, 3200, %s178_s3, [#allocation7], %s1013_s18, %s1013_s18, %s1014_s20  }
  0x46   : > { %p1345_p0 = scmp.ne.s32.totalorder %s1344_s28, 0 }
  0x47   : > { %s191_s4 = sand.u32 (!%p1345_p0), 1, %s998_s13   ;;  %p1346_p5 = scmp.ne.s32.totalorder (!%p1345_p0), %s1340_s21, 0 }
  0x48   : > { %189 = sbr.rel (%p1345_p0) target bundleno = 171 (0xab), region = 28  ;;  %s192_s6 = scalar_lea.sflag (!%p1345_p0), [#allocation4], %s191_s4 }
  0x49   : > { %s722_s5 = smul.u32 (!%p1345_p0), 200, %s191_s4 }
  0x4b   : > { %s1170_s7 = scalar_lea.vmem (!%p1345_p0), [#allocation3], %s722_s5 }
  0x4f   : > { %968 = dma.done.wait (%p1346_p5), %s192_s6, 3200  }
  0x50   : > { %970 = vsyncadd (%p1346_p5), %s192_s6, 4294964096  ;;  %s201_s27 = scalar_lea.sflag [#allocation7], %s191_s4  ;;  %s1176_s8 = scalar_lea.vmem [#allocation6], %s722_s5 }
  0x51   : > { %972 = dma.done.wait (%p1346_p5), %s201_s27, 3200  }
  0x52   : > { %974 = vsyncadd (%p1346_p5), %s201_s27, 4294964096  ;;  %v241_v0 = vlaneseq  ;;  %v1189_v6 = vld [vmem:[%s1170_s7] sm:$0xff]  ;;  %v1192_v7 = vld [vmem:[%s1170_s7 + $0x8] sm:$0xff]  ;;  %v1016_v54 = vmov 0.0   ;;  %s715_s21 = sshll.u32 %s1002_s14, 10  ;;  %s227_s18 = sand.u32 1, %s986_s10  }
  0x53   : > { %v1195_v8 = vld [vmem:[%s1170_s7 + $0x10] sm:$0xff]  ;;  %v671_v11 = vmul.f32 -1.442695, %v1189_v6  ;;  %v1202_v12 = vld [vmem:[%s1170_s7 + $0x18] sm:$0xff]  ;;  %v672_v14 = vmul.f32 -1.442695, %v1192_v7 }
  0x54   : > { %v1182_v1 = vshrl.u32 %v241_v0, 7  ;;  %v1184_v2 = vand.u32 127, %v241_v0  ;;  %v1198_v10 = vld [vmem:[%s1176_s8] sm:$0xff]  ;;  %v1205_v13 = vld [vmem:[%s1176_s8 + $0x8] sm:$0xff]  ;;  %v1209_v16 = vld [vmem:[%s1176_s8 + $0x10] sm:$0xff]  ;;  %s662_s20 = sshll.u32 %s227_s18, 3 }
  0x55   : > { %817 = vpow2.f32 %v671_v11  ;;  %v307_v17 = vmul.f32 1.442695, %v1195_v8  ;;  %v1213_v18 = vld [vmem:[%s1176_s8 + $0x18] sm:$0xff]  ;;  %v673_v19 = vmul.f32 -1.442695, %v1198_v10  ;;  %v676_v25 = vld [vmem:[%s1176_s8 + $0x28] sm:$0xff] }
  0x56   : > { %v243_v3 = vcvt.s32.f32 %v1182_v1  ;;  %v246_v4 = vcvt.s32.f32 %v1184_v2  ;;  %819 = vpow2.f32 %v672_v14  ;;  %v674_v20 = vmul.f32 -1.442695, %v1205_v13  ;;  %v675_v23 = vld [vmem:[%s1170_s7 + $0x28] sm:$0xff]  ;;  %v677_v26 = vld [vmem:[%s1170_s7 + $0x30] sm:$0xff]  ;;  %v678_v27 = vld [vmem:[%s1176_s8 + $0x30] sm:$0xff]  ;;  %s717_s28 = sshll.u32 %s1002_s14, 7 }
  0x57   : > { %v311_v22 = vmul.f32 1.442695, %v1202_v12  ;;  %821 = vpow2.f32 %v307_v17  ;;  %v330_v24 = vmul.f32 1.442695, %v1209_v16  ;;  %v333_v29 = vmul.f32 1.442695, %v1213_v18  ;;  %s1281_s22 = scalar_lea.hbm %s1336_s2, %s717_s28 }
  0x58   : > { %v247_v5 = vmul.f32 128.0, %v243_v3  ;;  %823 = vpow2.f32 %v673_v19  ;;  %v679_v30 = vld [vmem:[%s1170_s7 + $0x38] sm:$0xff]  ;;  %v680_v31 = vld [vmem:[%s1176_s8 + $0x38] sm:$0xff]  ;;  %v378_v32 = vsub.f32 %v675_v23, %v676_v25  ;;  %v385_v33 = vsub.f32 %v677_v26, %v678_v27  ;;  %v681_v34 = vld [vmem:[%s1170_s7 + $0x40] sm:$0xff]  ;;  %s229_s3 = scalar_lea.vmem [#allocation8], %s662_s20  ;;  %s541_s23 = scalar_lea.sflag [#allocation5], %s227_s18 }
  0x59   : > { %825 = vpow2.f32 %v674_v20  ;;  %v682_v35 = vld [vmem:[%s1176_s8 + $0x40] sm:$0xff]  ;;  %v683_v36 = vld [vmem:[%s1170_s7 + $0x48] sm:$0xff]  ;;  %v684_v38 = vld [vmem:[%s1176_s8 + $0x48] sm:$0xff]  ;;  %v392_v46 = vsub.f32 %v679_v30, %v680_v31  ;;  %s554_s29 = sshll.u32 %s229_s3, 4  ;;  %p1347_p8 = scmp.ne.s32.totalorder %s1341_s25, 0  ;;  %s1283_s29 = int_to_ptr.vmem [resolvable:$true] %s554_s29 }
  0x5a   : > { %v248_v9 = vadd.f32 %v247_v5, %v246_v4  ;;  %827 = vpow2.f32 %v311_v22  ;;  %v685_v39 = vld [vmem:[%s1170_s7 + $0x50] sm:$0xff]  ;;  %v686_v40 = vld [vmem:[%s1176_s8 + $0x50] sm:$0xff]  ;;  %v379_v41 = vmul.f32 %v378_v32, %v378_v32  ;;  %v386_v42 = vmul.f32 %v385_v33, %v385_v33  ;;  %v687_v43 = vld [vmem:[%s1170_s7 + $0x58] sm:$0xff]  ;;  %s903_s30 = scalar_lea.vmem %s1283_s29, 128  ;;  %s1017_s14 = smov [#allocation8]  }
  0x5b   : > { %829 = vpow2.f32 %v330_v24  ;;  %v688_v44 = vld [vmem:[%s1176_s8 + $0x58] sm:$0xff]  ;;  %v399_v48 = vsub.f32 %v681_v34, %v682_v35  ;;  %v406_v49 = vsub.f32 %v683_v36, %v684_v38  ;;  %v413_v50 = vsub.f32 %v685_v39, %v686_v40  ;;  %v689_v20 = vld [vmem:[%s1170_s7 + $0x60] sm:$0xff]  ;;  %v690_v25 = vld [vmem:[%s1176_s8 + $0x60] sm:$0xff]  ;;  %p904_p2 = scmp.ne.s32.totalorder %s1283_s29, %s903_s30  ;;  %s907_s4 = sshll.u32 %s1017_s14, 4  ;;  %s908_s4 = int_to_ptr.vmem [resolvable:$false] %s907_s4 }
  0x5c   : > { %v249_v15 = vadd.f32 0.5, %v248_v9  ;;  %831 = vpow2.f32 %v333_v29  ;;  %v387_v47 = vadd.f32 %v386_v42, %v379_v41  ;;  %v420_v52 = vsub.f32 %v687_v43, %v688_v44  ;;  %v691_v26 = vld [vmem:[%s1170_s7 + $0x68] sm:$0xff]  ;;  %v692_v27 = vld [vmem:[%s1176_s8 + $0x68] sm:$0xff]  ;;  %v693_v33 = vld [vmem:[%s1170_s7 + $0x70] sm:$0xff]  ;;  %s909_s5 = scalar_lea.vmem %s908_s4, 256  ;;  %p910_p11 = scmp.lt.s32.totalorder %s1283_s29, %s908_s4 }
  0x5d   : > { %v393_v0 = vmul.f32 %v392_v46, %v392_v46  ;;  %v407_v24 = vmul.f32 %v406_v49, %v406_v49  ;;  %v414_v31 = vmul.f32 %v413_v50, %v413_v50  ;;  %v694_v34 = vld [vmem:[%s1176_s8 + $0x70] sm:$0xff]  ;;  %v434_v38 = vsub.f32 %v691_v26, %v692_v27  ;;  %v695_v40 = vld [vmem:[%s1170_s7 + $0x78] sm:$0xff]  ;;  %v696_v41 = vld [vmem:[%s1176_s8 + $0x78] sm:$0xff]  ;;  %p905_p9 = pnand %p904_p2, %p1347_p8  ;;  %p911_p1 = scmp.lt.s32.totalorder %s909_s5, %s903_s30 }
  0x5e   : > { %v251_v21 = vmul.f32 0.2, %v249_v15  ;;  %v421_v36 = vmul.f32 %v420_v52, %v420_v52  ;;  %v697_v42 = vld [vmem:[%s1170_s7 + $0x80] sm:$0xff]  ;;  %v441_v46 = vsub.f32 %v693_v33, %v694_v34  ;;  %v700_v49 = vld [vmem:[%s1176_s8 + $0x88] sm:$0xff] }
  0x5f   : > { %v818_v51 = vpop.eup %817  ;;  %v394_v19 = vadd.f32 %v393_v0, %v387_v47  ;;  %v698_v47 = vld [vmem:[%s1176_s8 + $0x80] sm:$0xff]  ;;  %p906_p10 = pneg %p905_p9  ;;  %p912_p3 = por %p911_p1, %p910_p11 }
  0x60   : > { %v252_v28 = vfloor.f32 %v251_v21  ;;  %v820_v53 = vpop.eup %819  ;;  %v297_v57 = vadd.f32 1.0, %v818_v51 }
  0x61   : > { %v303_v60 = vadd.f32 1.0, %v820_v53  ;;  %v822_v61 = vpop.eup %821  ;;  %p913_p4 = pnand %p912_p3, %p906_p10 }
  0x62   : > { %v253_v37 = vmul.f32 5.0, %v252_v28  ;;  %833 = vrcp.f32 %v297_v57  ;;  %v824_v3 = vpop.eup %823 }
  0x63   : > { %835 = vrcp.f32 %v303_v60  ;;  %v826_v11 = vpop.eup %825  ;;  %v321_v17 = vadd.f32 1.0, %v824_v3  ;;  %v455_v60 = vsub.f32 %v697_v42, %v698_v47  ;;  %v708_v42 = vld [vmem:[%s1176_s8 + $0xa8] sm:$0xff] }
  0x64   : > { %v254_v45 = vsub.f32 %v248_v9, %v253_v37  ;;  %v400_v9 = vmul.f32 %v399_v48, %v399_v48  ;;  %v828_v21 = vpop.eup %827  ;;  %v327_v23 = vadd.f32 1.0, %v826_v11  ;;  %v427_v37 = vsub.f32 %v689_v20, %v690_v25  ;;  %v699_v48 = vld [vmem:[%s1170_s7 + $0x88] sm:$0xff]  ;;  %v703_v11 = vld [vmem:[%s1170_s7 + $0x98] sm:$0xff] }
  0x65   : > { %v830_v28 = vpop.eup %829  ;;  %837 = vrcp.f32 %v321_v17  ;;  %v456_v25 = vmul.f32 %v455_v60, %v455_v60 }
  0x66   : > { %vm255_vm0 = vcmp.eq.f32.partialorder %v254_v45, 0.0  ;;  %vm258_vm1 = vcmp.eq.f32.partialorder %v254_v45, 1.0  ;;  %vm261_vm2 = vcmp.eq.f32.partialorder %v254_v45, 2.0  ;;  %vm264_vm3 = vcmp.eq.f32.partialorder %v254_v45, 3.0  ;;  %v832_v32 = vpop.eup %831 }
  0x67   : > { %v256_v55 = vsel %vm255_vm0, 1.3221, %v1016_v54  ;;  %v257_v56 = vsel %vm255_vm0, 1.73145, %v1016_v54  ;;  %vm267_vm4 = vcmp.eq.f32.partialorder %v254_v45, 4.0  ;;  %v401_v30 = vadd.f32 %v400_v9, %v394_v19 }
  0x68   : > { %v259_v58 = vsel %vm258_vm1, 3.19275, %v256_v55  ;;  %v260_v59 = vsel %vm258_vm1, 4.00944, %v257_v56  ;;  %839 = vrcp.f32 %v327_v23  ;;  %v428_v45 = vmul.f32 %v427_v37, %v427_v37 }
  0x69   : > { %v262_v62 = vsel %vm261_vm2, 5.05587, %v259_v58  ;;  %v263_v63 = vsel %vm261_vm2, 8.09892, %v260_v59  ;;  %v408_v35 = vadd.f32 %v407_v24, %v401_v30  ;;  %v435_v55 = vmul.f32 %v434_v38, %v434_v38 }
  0x6a   : > { %v265_v4 = vsel %vm264_vm3, 9.47112, %v262_v62  ;;  %v266_v5 = vsel %vm264_vm3, 4.84053, %v263_v63  ;;  %v448_v56 = vsub.f32 %v695_v40, %v696_v41  ;;  %v701_v62 = vld [vmem:[%s1170_s7 + $0x90] sm:$0xff]  ;;  %v702_v63 = vld [vmem:[%s1176_s8 + $0x90] sm:$0xff] }
  0x6b   : > { %v268_v14 = vsel %vm267_vm4, 11.2364, %v265_v4  ;;  %v269_v15 = vsel %vm267_vm4, 10.0071, %v266_v5  ;;  %v415_v44 = vadd.f32 %v414_v31, %v408_v35  ;;  %v442_v5 = vmul.f32 %v441_v46, %v441_v46  ;;  %v705_v35 = vld [vmem:[%s1170_s7 + $0xa0] sm:$0xff]  ;;  %v707_v41 = vld [vmem:[%s1170_s7 + $0xa8] sm:$0xff] }
  0x6c   : > { %v306_v22 = vmul.f32 0.5, %v268_v14  ;;  %v310_v29 = vmul.f32 0.5, %v269_v15  ;;  %v834_v51 = vpop.eup %833  ;;  %v704_v14 = vld [vmem:[%s1176_s8 + $0x98] sm:$0xff]  ;;  %v449_v20 = vmul.f32 %v448_v56, %v448_v56 }
  0x6d   : > { %v422_v52 = vadd.f32 %v421_v36, %v415_v44  ;;  %v836_v57 = vpop.eup %835  ;;  %v476_v30 = vsub.f32 %v703_v11, %v704_v14  ;;  %v706_v36 = vld [vmem:[%s1176_s8 + $0xa0] sm:$0xff]  ;;  %v371_v11 = vsub.f32 %v1202_v12, %v1213_v18 }
  0x6e   : > { %v309_v39 = vmul.f32 %v822_v61, %v306_v22  ;;  %v313_v43 = vmul.f32 %v828_v21, %v310_v29  ;;  %v332_v50 = vmul.f32 %v830_v28, %v306_v22  ;;  %v335_v53 = vmul.f32 %v832_v32, %v310_v29 }
  0x6f   : > { %v462_v61 = vsub.f32 %v699_v48, %v700_v49  ;;  %v429_v4 = vadd.f32 %v428_v45, %v422_v52  ;;  %v838_v15 = vpop.eup %837  ;;  %v469_v21 = vsub.f32 %v701_v62, %v702_v63  ;;  %v483_v48 = vsub.f32 %v705_v35, %v706_v36 }
  0x70   : > { %v314_v58 = vsub.f32 %v834_v51, %v309_v39  ;;  %v316_v59 = vadd.f32 %v834_v51, %v309_v39  ;;  %v315_v0 = vsub.f32 %v836_v57, %v313_v43  ;;  %v317_v3 = vadd.f32 %v836_v57, %v313_v43 }
  0x71   : > { %v436_v19 = vadd.f32 %v435_v55, %v429_v4  ;;  %v336_v23 = vsub.f32 %v838_v15, %v332_v50  ;;  %v338_v24 = vadd.f32 %v838_v15, %v332_v50  ;;  %v463_v26 = vmul.f32 %v462_v61, %v462_v61  ;;  %v711_v4 = vld [vmem:[%s1170_s7 + $0xb8] sm:$0xff] }
  0x72   : > { %v349_v9 = vsub.f32 %v316_v59, %v314_v58  ;;  %v350_v17 = vsub.f32 %v317_v3, %v315_v0  ;;  %v840_v22 = vpop.eup %839  ;;  %v470_v44 = vmul.f32 %v469_v21, %v469_v21  ;;  %v363_v50 = vsub.f32 %v1189_v6, %v1198_v10  ;;  %v714_v21 = vld [vmem:[%s1176_s8 + $0xc0] sm:$0xff] }
  0x73   : > { %v337_v27 = vsub.f32 %v840_v22, %v335_v53  ;;  %v339_v28 = vadd.f32 %v840_v22, %v335_v53  ;;  %v443_v29 = vadd.f32 %v442_v5, %v436_v19  ;;  %v340_v31 = vmin.f32 %v316_v59, %v338_v24  ;;  %v710_v59 = vld [vmem:[%s1176_s8 + $0xb0] sm:$0xff]  ;;  %v712_v5 = vld [vmem:[%s1176_s8 + $0xb8] sm:$0xff] }
  0x74   : > { %v341_v32 = vmax.f32 %v314_v58, %v336_v23  ;;  %v351_v33 = vmul.f32 %v350_v17, %v349_v9  ;;  %v352_v34 = vsub.f32 %v338_v24, %v336_v23  ;;  %v365_v51 = vsub.f32 %v1192_v7, %v1205_v13  ;;  %v709_v58 = vld [vmem:[%s1170_s7 + $0xb0] sm:$0xff] }
  0x75   : > { %v344_v37 = vmin.f32 %v317_v3, %v339_v28  ;;  %v345_v38 = vmax.f32 %v315_v0, %v337_v27  ;;  %v353_v39 = vsub.f32 %v339_v28, %v337_v27  ;;  %v450_v40 = vadd.f32 %v449_v20, %v443_v29  ;;  %v670_v27 = vld [vmem:[%s1176_s8 + $0x20] sm:$0xff] }
  0x76   : > { %v342_v43 = vsub.f32 %v340_v31, %v341_v32  ;;  %v490_v53 = vsub.f32 %v707_v41, %v708_v42  ;;  %v477_v57 = vmul.f32 %v476_v30, %v476_v30  ;;  %v484_v62 = vmul.f32 %v483_v48, %v483_v48 }
  0x77   : > { %v346_v45 = vsub.f32 %v344_v37, %v345_v38  ;;  %v354_v46 = vmul.f32 %v353_v39, %v352_v34  ;;  %v457_v47 = vadd.f32 %v456_v25, %v450_v40  ;;  %v364_v63 = vmul.f32 %v363_v50, %v363_v50  ;;  %v666_v34 = vld [vmem:[%s1170_s7 + $0x20] sm:$0xff] }
  0x78   : > { %v343_v49 = vmax.f32 %v342_v43, 0.0  ;;  %v366_v0 = vmul.f32 %v365_v51, %v365_v51  ;;  %v368_v6 = vsub.f32 %v1195_v8, %v1209_v16  ;;  %v497_v10 = vsub.f32 %v709_v58, %v710_v59  ;;  %v713_v16 = vld [vmem:[%s1170_s7 + $0xc0] sm:$0xff] }
  0x79   : > { %v347_v52 = vmax.f32 %v346_v45, 0.0  ;;  %v355_v55 = vadd.f32 %v354_v46, %v351_v33  ;;  %v464_v56 = vadd.f32 %v463_v26, %v457_v47  ;;  %v491_v3 = vmul.f32 %v490_v53, %v490_v53 }
  0x7a   : > { %v367_v15 = vadd.f32 %v366_v0, %v364_v63  ;;  %v369_v17 = vmul.f32 %v368_v6, %v368_v6  ;;  %v498_v19 = vmul.f32 %v497_v10, %v497_v10  ;;  %v504_v20 = vsub.f32 %v711_v4, %v712_v5 }
  0x7b   : > { %v348_v60 = vmul.f32 %v347_v52, %v343_v49  ;;  %v471_v61 = vadd.f32 %v470_v44, %v464_v56  ;;  %v372_v22 = vmul.f32 %v371_v11, %v371_v11  ;;  %v511_v26 = vsub.f32 %v713_v16, %v714_v21 }
  0x7c   : > { %v370_v23 = vadd.f32 %v369_v17, %v367_v15  ;;  %v505_v25 = vmul.f32 %v504_v20, %v504_v20  ;;  %vm360_vm5 = vcmp.gt.f32.partialorder %v670_v27, 0.0  ;;  %v530_v35 = vmul.u32 128, %v1182_v1 }
  0x7d   : > { %v356_v7 = vsub.f32 %v355_v55, %v348_v60  ;;  %v478_v13 = vadd.f32 %v477_v57, %v471_v61  ;;  %v512_v18 = vmul.f32 %v511_v26, %v511_v26  ;;  %v361_v30 = vsel %vm360_vm5, 1.0, %v1016_v54 }
  0x7e   : > { %v373_v28 = vadd.f32 %v372_v22, %v370_v23  ;;  %v514_v37 = vmul.f32 %v666_v34, %v666_v34  ;;  %v531_v38 = vstv %s715_s21 }
  0x7f   : > { %v357_v9 = vadd.f32 1e-16, %v356_v7  ;;  %v485_v14 = vadd.f32 %v484_v62, %v478_v13  ;;  %v532_v41 = vadd.s32 %v531_v38, %v530_v35 }
  0x80   : > { %v517_v33 = vmul.f32 5.0, %v373_v28  ;;  %v520_v43 = vmul.f32 0.5, %v514_v37 }
  0x81   : > { %841 = vrcp.f32 %v357_v9  ;;  %v492_v8 = vadd.f32 %v491_v3, %v485_v14  ;;  %v533_v54 = vadd.s32 %v532_v41, %v1184_v2 }
  0x83   : > { %v499_v24 = vadd.f32 %v498_v19, %v492_v8  ;;  %vm534_vm6 = vcmp.lt.s32.totalorder %v533_v54, 640 }
  0x85   : > { %v506_v12 = vadd.f32 %v505_v25, %v499_v24 }
  0x87   : > { %v513_v32 = vadd.f32 %v512_v18, %v506_v12 }
  0x89   : > { %v518_v40 = vadd.f32 %v517_v33, %v513_v32 }
  0x8b   : > { %v842_v29 = vpop.eup %841 }
  0x8c   : > { %v359_v31 = vmul.f32 %v842_v29, %v348_v60 }
  0x8e   : > { %v362_v36 = vmul.f32 %v361_v30, %v359_v31 }
  0x90   : > { %v515_v39 = vsub.f32 %v666_v34, %v362_v36 }
  0x92   : > { %v516_v42 = vmul.f32 %v515_v39, %v515_v39 }
  0x94   : > { %v519_v44 = vadd.f32 %v518_v40, %v516_v42 }
  0x96   : > { %v521_v45 = vsub.f32 %v519_v44, %v520_v43 }
  0x98   : > { %v522_v46 = vmul.f32 %v521_v45, %v361_v30 }
  0x9a   : > { %v523_v47 = vadd.f32 %v522_v46, %v520_v43 }
  0x9c   : > { %v535_v1 = vsel %vm534_vm6, %v523_v47, 0.0 }
  0x9d   : > { %539 = vst [vmem:[%s229_s3] sm:$0xff] %v535_v1 }
  0x9e   : > { %916 = shalt.err (!%p913_p4)
}
  0x9f   : > { %s917_s6 = scalar_lea.hbm %s1281_s22, 128  ;;  %s921_s8 = scalar_lea.hbm %s1336_s2, 256 }
  0xa0   : > { %p918_p13 = scmp.ne.s32.totalorder %s1281_s22, %s917_s6  ;;  %p922_p12 = scmp.lt.u32.totalorder %s1281_s22, %s1336_s2 }
  0xa1   : > { %p923_p0 = scmp.lt.u32.totalorder %s921_s8, %s917_s6  ;;  %p925_p2 = scmp.lt.u32.totalorder %s917_s6, %s1281_s22 }
  0xa2   : > { %p919_p7 = pnand %p918_p13, %p1347_p8 }
  0xa3   : > { %p924_p5 = por %p923_p0, %p922_p12 }
  0xa4   : > { %p920_p6 = pneg %p919_p7 }
  0xa5   : > { %p926_p9 = por %p925_p2, %p924_p5 }
  0xa7   : > { %p927_p10 = pnand %p926_p9, %p920_p6 }
  0xa9   : > { %930 = shalt.err (!%p927_p10)
}
  0xaa   : > { %727 = dma.vmem_to_hbm [thread:$0]  (%p1347_p8), %s1283_s29, 128, %s1281_s22, %s541_s23  }
  0xab PF: > { %s566_s20 = sand.u32 1, %s982_s9   ;;  %p1348_p11 = scmp.ne.s32.totalorder %s1342_s26, 0 }
  0xac   : > { %p1349_p1 = scmp.ge.s32.totalorder %s1010_s16, 2  ;;  %s567_s28 = scalar_lea.sflag [#allocation5], %s566_s20 }
  0xae   : > { %p737_p3 = pnand %p1349_p1, %p1348_p11 }
  0xb0   : > { %976 = dma.done.wait (!%p737_p3), %s567_s28, 128  }
  0xb1   : > { %978 = vsyncadd (!%p737_p3), %s567_s28, 4294967168  ;;  %s21_s16 = sadd.s32 1, %s1010_s16   ;;  %s1350_s9 = smov %s986_s10 }
  0xb2   : > { %p18_p4 = scmp.ge.s32.totalorder %s21_s16, 4   ;;  %s1351_s10 = smov %s990_s11 }
  0xb3   : > { %s1352_s11 = smov %s1091_s24  ;;  %s1353_s12 = smov %s998_s13 }
  0xb4   : > { %s1324_s13 = smov 0   ;;  %s1354_s14 = smov %s1006_s15 }
  0xb5   : > { %s1355_s15 = smov %s1357_s19  ;;  %20 = sbr.rel (!%p18_p4) target bundleno = 9 (0x9), region = 140 }
  0xbc   :  { %572 = vsyncpa [#allocation4], 1 }
  0xbd   :  { %574 = vsyncpa [#allocation4 + $0x1], 1 }
  0xbe   :  { %575 = vsyncpa [#allocation7], 1 }
  0xbf   :  { %577 = vsyncpa [#allocation7 + $0x1], 1 }
  0xc0   :  { %578 = vsyncpa [#allocation5], 1 }
  0xc1   :  { %580 = vsyncpa [#allocation5 + $0x1], 1 }

</bundles_post_ra>
